<compile_context>
chip_gen: v7x
topology: tpu7x:2x2x1
jax: 0.10.0
libtpu: 0.0.40
codegen_flags: <defaults>
</compile_context>

<pallas_src>
import math

import jax
import jax.numpy as jnp
import numpy as np
from jax.experimental import pallas as pl
from jax.experimental.pallas import tpu as pltpu

LANES = 128
_TARGET_BLOCK_BYTES = 2 * 1024 * 1024        # ~2 MiB qw block per grid step
_VMEM_BLOCK_BUDGET = 24 * 1024 * 1024        # 2 bufs x 4 arrays x block bytes
_VMEM_LIMIT_BYTES = 32 * 1024 * 1024


def make_rope_tables(max_position: int, embedding_size: int):
    """Deterministic buffer setup (mirrors get_sinusoid_encoding_table +
    repeat_interleave in the module __init__). Plain-JAX glue, float32."""
    d = embedding_size
    position = jnp.arange(max_position, dtype=jnp.float32)[:, None]          # (P, 1)
    div_term = jnp.exp(jnp.arange(0, d, 2, dtype=jnp.float32)
                       * (-math.log(10000.0) / d))                           # (D/2,)
    sin_part = jnp.sin(position * div_term)                                  # table[:, 0::2]
    cos_part = jnp.cos(position * div_term)                                  # table[:, 1::2]
    cos_position = jnp.repeat(cos_part, 2, axis=-1)                          # (P, D)
    sin_position = jnp.repeat(sin_part, 2, axis=-1)                          # (P, D)
    return cos_position, sin_position


def rope_kernel(qw_ref, cos_ref, sin_ref, out_ref):
    # qw_ref/out_ref: (1, TR, 128) tile; cos_ref/sin_ref: (TR, 128), resident
    # across the (inner) batch grid axis.  sin_ref already carries the parity
    # sign (-sin on even lanes, +sin on odd lanes).
    x = qw_ref[0].astype(jnp.float32)          # compute in f32 (matches torch)
    cos = cos_ref[...].astype(jnp.float32)
    sin_signed = sin_ref[...].astype(jnp.float32)

    last = x.ndim - 1                          # pltpu.roll needs a non-negative axis
    L = x.shape[last]

    # Rotation = lane-pair swap: even lanes take x[j+1], odd lanes take x[j-1].
    # Built from two XLU lane rotations + a lane-parity select; the roll
    # wrap-around lanes (0 / L-1) are never selected by the parity mask, so the
    # 128-lane fold of (S, D) stays semantics-preserving.
    lane = jax.lax.broadcasted_iota(jnp.int32, x.shape, dimension=last)
    even_lane = (lane & 1) == 0
    x_left = pltpu.roll(x, shift=L - 1, axis=last)   # x_left[j]  = x[(j+1) % L]
    x_right = pltpu.roll(x, shift=1, axis=last)      # x_right[j] = x[(j-1) % L]
    sel = jnp.where(even_lane, x_left, x_right)

    out_ref[0] = (x * cos + sel * sin_signed).astype(out_ref.dtype)


def rope_forward(qw, cos_position, sin_position, *, target_rows=None):
    """qw: (B, S, D). cos_position/sin_position: (max_position, D) float32."""
    B, S, D = qw.shape
    assert D % 2 == 0, "RoPE requires an even embedding size"
    dtype = qw.dtype
    itemsize = jnp.dtype(dtype).itemsize
    sub_align = max(8, 32 // itemsize)        # 8 (f32) / 16 (bf16) / 32 (int8)

    # Slice to seq_len (like the torch forward); tables travel in qw.dtype for
    # bandwidth, the kernel upcasts to f32 for the math.  Fold the rotation
    # sign into the sin table: even lanes -> -sin, odd lanes -> +sin.
    cos_s = cos_position[:S].astype(dtype)
    sin_s = sin_position[:S].astype(dtype)
    d_idx = jnp.arange(D)
    sin_signed = jnp.where((d_idx % 2) == 0, -sin_s, sin_s)

    # Lane-dense fold: the rotation only mixes adjacent (even, odd) pairs and D
    # is even, so (S, D) can be flattened into 128-lane rows.  If S*D is not a
    # multiple of 128 we zero-pad the flattened tail (padded lanes are sliced
    # off after the kernel; no pad value ever leaks into a valid output lane).
    total = S * D
    rows = pl.cdiv(total, LANES)
    pad = rows * LANES - total

    qw_flat = qw.reshape(B, total)
    cos_flat = cos_s.reshape(total)
    sin_flat = sin_signed.reshape(total)
    if pad:
        qw_flat = jnp.pad(qw_flat, ((0, 0), (0, pad)))
        cos_flat = jnp.pad(cos_flat, (0, pad))
        sin_flat = jnp.pad(sin_flat, (0, pad))

    qw_f = qw_flat.reshape(B, rows, LANES)
    cos_f = cos_flat.reshape(rows, LANES)
    sin_f = sin_flat.reshape(rows, LANES)

    # Row-tile choice: ~2 MiB per qw block, clamped so the double-buffered
    # footprint (2 bufs x {qw, out, cos, sin}) stays within the VMEM budget.
    if target_rows is None:
        target_rows = max(sub_align, _TARGET_BLOCK_BYTES // (LANES * itemsize))
    max_rows_by_vmem = max(sub_align,
                           _VMEM_BLOCK_BUDGET // (2 * 4 * LANES * itemsize))
    target = min(target_rows, max_rows_by_vmem)

    if rows <= target:
        tr = rows                               # full extent: always legal
    else:
        tr = max(sub_align, (target // sub_align) * sub_align)

    grid = (pl.cdiv(rows, tr), B)               # B innermost -> cos/sin resident

    out = pl.pallas_call(
        rope_kernel,
        out_shape=jax.ShapeDtypeStruct((B, rows, LANES), dtype),
        grid=grid,
        in_specs=[
            pl.BlockSpec((1, tr, LANES), lambda r, b: (b, r, 0)),
            pl.BlockSpec((tr, LANES), lambda r, b: (r, 0)),
            pl.BlockSpec((tr, LANES), lambda r, b: (r, 0)),
        ],
        out_specs=pl.BlockSpec((1, tr, LANES), lambda r, b: (b, r, 0)),
        compiler_params=pltpu.CompilerParams(
            # Megacore (v7x) splits the row-tile axis (balanced even for B=1).
            dimension_semantics=("parallel", "arbitrary"),
            vmem_limit_bytes=_VMEM_LIMIT_BYTES,
        ),
    )(qw_f, cos_f, sin_f)

    out_flat = out.reshape(B, rows * LANES)
    if pad:
        out_flat = out_flat[:, :total]
    return out_flat.reshape(B, S, D)


def rope_reference(qw, cos_position, sin_position):
    """Pure-JAX reference replicating the torch forward exactly (f32)."""
    S = qw.shape[-2]
    qw_even = qw[..., 0::2]
    qw_odd = qw[..., 1::2]
    qw2 = jnp.stack([-qw_odd, qw_even], axis=-1).reshape(qw.shape)
    return qw * cos_position[:S] + qw2 * sin_position[:S]


if __name__ == "__main__":
    key = jax.random.PRNGKey(0)
    k1, k2, k3, k4 = jax.random.split(key, 4)

    # Test 1: module-scale demo shapes (B=2, S=8, D=32) — folds to 2 rows of 128.
    B, S, D = 2, 8, 32
    MAX_POSITION = 16
    qw = jax.random.normal(k1, (B, S, D), dtype=jnp.float32)
    cos_position, sin_position = make_rope_tables(MAX_POSITION, D)
    out = jax.block_until_ready(rope_forward(qw, cos_position, sin_position))
    ref = rope_reference(qw, cos_position, sin_position)
    np.testing.assert_allclose(np.asarray(out), np.asarray(ref), rtol=1e-5, atol=1e-5)

    # Test 2: force multiple row tiles with a ragged tail (cdiv masking path).
    B2, S2, D2 = 2, 40, 64                       # rows = 20, tr = 8 -> grid 3x2
    cos2, sin2 = make_rope_tables(S2, D2)
    qw2 = jax.random.normal(k2, (B2, S2, D2), dtype=jnp.float32)
    out2 = jax.block_until_ready(rope_forward(qw2, cos2, sin2, target_rows=8))
    ref2 = rope_reference(qw2, cos2, sin2)
    np.testing.assert_allclose(np.asarray(out2), np.asarray(ref2), rtol=1e-5, atol=1e-5)

    # Test 3: S*D not a multiple of 128 -> wrapper pad path.
    B3, S3, D3 = 2, 13, 24                       # total = 312 -> padded to 384
    cos3, sin3 = make_rope_tables(S3, D3)
    qw3 = jax.random.normal(k3, (B3, S3, D3), dtype=jnp.float32)
    out3 = jax.block_until_ready(rope_forward(qw3, cos3, sin3))
    ref3 = rope_reference(qw3, cos3, sin3)
    np.testing.assert_allclose(np.asarray(out3), np.asarray(ref3), rtol=1e-5, atol=1e-5)

    # Test 4: bf16 activations (dtype-aware alignment; kernel upcasts to f32).
    B4, S4, D4 = 2, 16, 64
    cos4, sin4 = make_rope_tables(S4, D4)
    qw4 = jax.random.normal(k4, (B4, S4, D4), dtype=jnp.float32).astype(jnp.bfloat16)
    out4 = jax.block_until_ready(rope_forward(qw4, cos4, sin4))
    ref4 = rope_reference(qw4.astype(jnp.float32), cos4, sin4)
    np.testing.assert_allclose(np.asarray(out4, dtype=np.float32), np.asarray(ref4),
                               rtol=5e-2, atol=5e-2)

    print("KERNEL_OK")
</pallas_src>

<mosaic_0001>
module attributes {stable_mosaic.version = 11 : i64} {
  func.func @rope_kernel(%arg0: i32, %arg1: i32, %arg2: memref<1x2x128xf32, #tpu.memory_space<vmem>>, %arg3: memref<2x128xf32, #tpu.memory_space<vmem>>, %arg4: memref<2x128xf32, #tpu.memory_space<vmem>>, %arg5: memref<1x2x128xf32, #tpu.memory_space<vmem>>) attributes {dimension_semantics = [#tpu.dimension_semantics<parallel>, #tpu.dimension_semantics<arbitrary>], iteration_bounds = array<i64: 1, 2>, scalar_prefetch = 0 : i64, scratch_operands = 0 : i64, tpu.core_type = #tpu.core_type<tc>, window_params = [{transform_indices = @transform_0, window_bounds = array<i64: 1, 2, 128>}, {transform_indices = @transform_1, window_bounds = array<i64: 2, 128>}, {transform_indices = @transform_2, window_bounds = array<i64: 2, 128>}, {transform_indices = @transform_3, window_bounds = array<i64: 1, 2, 128>}]} {
    %c0 = arith.constant 0 : index
    %c0_0 = arith.constant 0 : index
    %c0_1 = arith.constant 0 : index
    %0 = vector.load %arg2[%c0, %c0_0, %c0_1] : memref<1x2x128xf32, #tpu.memory_space<vmem>>, vector<1x2x128xf32>
    %1 = vector.shape_cast %0 : vector<1x2x128xf32> to vector<2x128xf32>
    %c0_2 = arith.constant 0 : index
    %c0_3 = arith.constant 0 : index
    %2 = vector.load %arg3[%c0_2, %c0_3] : memref<2x128xf32, #tpu.memory_space<vmem>>, vector<2x128xf32>
    %c0_4 = arith.constant 0 : index
    %c0_5 = arith.constant 0 : index
    %3 = vector.load %arg4[%c0_4, %c0_5] : memref<2x128xf32, #tpu.memory_space<vmem>>, vector<2x128xf32>
    %4 = tpu.iota {dimensions = array<i32: 1>} : vector<2x128xi32>
    %c1_i32 = arith.constant 1 : i32
    %5 = vector.broadcast %c1_i32 : i32 to vector<2x128xi32>
    %6 = arith.andi %4, %5 : vector<2x128xi32>
    %c0_i32 = arith.constant 0 : i32
    %7 = vector.broadcast %c0_i32 : i32 to vector<2x128xi32>
    %8 = arith.cmpi eq, %6, %7 : vector<2x128xi32>
    %c127_i32 = arith.constant 127 : i32
    %9 = tpu.dynamic_rotate %1 by %c127_i32 dim 1 : vector<2x128xf32>, i32 -> vector<2x128xf32>
    %c1_i32_6 = arith.constant 1 : i32
    %10 = tpu.dynamic_rotate %1 by %c1_i32_6 dim 1 : vector<2x128xf32>, i32 -> vector<2x128xf32>
    %11 = arith.select %8, %9, %10 : vector<2x128xi1>, vector<2x128xf32>
    %12 = arith.mulf %1, %2 : vector<2x128xf32>
    %13 = arith.mulf %11, %3 : vector<2x128xf32>
    %14 = arith.addf %12, %13 : vector<2x128xf32>
    %c0_7 = arith.constant 0 : index
    %c0_8 = arith.constant 0 : index
    %c0_9 = arith.constant 0 : index
    %15 = vector.load %arg5[%c0_7, %c0_8, %c0_9] : memref<1x2x128xf32, #tpu.memory_space<vmem>>, vector<1x2x128xf32>
    %16 = vector.shape_cast %15 : vector<1x2x128xf32> to vector<2x128xf32>
    %17 = vector.shape_cast %14 : vector<2x128xf32> to vector<1x2x128xf32>
    tpu.vector_store %arg5[%c0_7, %c0_8, %c0_9], %17 {strides = array<i32>} : memref<1x2x128xf32, #tpu.memory_space<vmem>>, vector<1x2x128xf32>,
    return
  }
  func.func @transform_0(%arg0: i32, %arg1: i32) -> (i32, i32, i32) {
    %c0_i32 = arith.constant 0 : i32
    %c0_i32_0 = arith.constant 0 : i32
    return %arg1, %arg0, %c0_i32 : i32, i32, i32
  }
  func.func @transform_1(%arg0: i32, %arg1: i32) -> (i32, i32) {
    %c0_i32 = arith.constant 0 : i32
    %c0_i32_0 = arith.constant 0 : i32
    return %arg0, %c0_i32 : i32, i32
  }
  func.func @transform_2(%arg0: i32, %arg1: i32) -> (i32, i32) {
    %c0_i32 = arith.constant 0 : i32
    %c0_i32_0 = arith.constant 0 : i32
    return %arg0, %c0_i32 : i32, i32
  }
  func.func @transform_3(%arg0: i32, %arg1: i32) -> (i32, i32, i32) {
    %c0_i32 = arith.constant 0 : i32
    %c0_i32_0 = arith.constant 0 : i32
    return %arg1, %arg0, %c0_i32 : i32, i32, i32
  }
}

</mosaic_0001>

<bundles_post_ra>
// kernel: tpu_custom_call.1
= control target key start
LH: loop header
LB: loop body
LE: loop exit
PB: predicated region body
PF: predicated region fallthrough
CT: control target
= control target key end

     0   :  { %8 = vsyncpa [#allocation3], 0  ;;  %s773_s0 = inlined_call_operand.hbm [shape: f32[2,2,128], index: 0, kind: input, shape index: {}]   ;;  %s774_s1 = inlined_call_operand.vmem [shape: f32[2,128], index: 1, kind: input, shape index: {}]   ;;  %s775_s2 = inlined_call_operand.vmem [shape: f32[2,128], index: 2, kind: input, shape index: {}]   ;;  %s776_s3 = inlined_call_operand.hbm [shape: f32[2,2,128], index: 3, kind: output, shape index: {}]  }
   0x1   :  { %10 = vsyncpa [#allocation3 + $0x1], 0 }
   0x2   :  { %11 = vsyncpa [#allocation4], 0 }
   0x3   :  { %13 = vsyncpa [#allocation4 + $0x1], 0  ;;  %s595_s12 = smov 0   ;;  %s597_s13 = smov 0  }
   0x4   :  { %s599_s14 = smov 0   ;;  %s601_s15 = smov 0  }
   0x5   :  { %s603_s16 = smov 0   ;;  %s605_s17 = smov 0  }
   0x6 LB: > { %s378_s18 = sadd.s32 4294967295, %s569_s17   ;;  %s379_s19 = sadd.s32 4294967294, %s569_s17   ;;  %s569_s17 = sphi %s605_s17, %s19_s17   ;;  %s565_s16 = sphi %s603_s16, %s792_s16   ;;  %s561_s15 = sphi %s601_s15, %s791_s15   ;;  %s557_s14 = sphi %s599_s14, %s790_s14   ;;  %s553_s13 = sphi %s597_s13, %s789_s13   ;;  %s549_s12 = sphi %s595_s12, %s788_s12  }
   0x7   : > { %s28_s20 = sadd.s32 1, %s565_s16  ;;  %s40_s21 = sadd.s32 1, %s557_s14 }
   0x8   : > { %p29_p0 = scmp.ge.s32.totalorder %s28_s20, 2  ;;  %p47_p1 = scmp.ne.s32.totalorder %s557_s14, %s553_s13 }
   0x9   : > { %p48_p2 = scmp.eq.s32.totalorder %s569_s17, 0  ;;  %p53_p3 = scmp.ne.s32.totalorder %s553_s13, %s549_s12 }
   0xa   : > { %s794_s20 = smov (%p29_p0, %s28_s20), 0  ;;  %p54_p5 = scmp.eq.s32.totalorder %s378_s18, 0 }
   0xb   : > { %p636_p4 = por %p48_p2, %p47_p1  ;;  %s35_s23 = ssub.s32 %s565_s16, %s794_s20 }
   0xc   : > { %p131_p6 = scmp.eq.s32.totalorder %s378_s18, 1  ;;  %p38_p7 = scmp.eq.s32.totalorder %s35_s23, 0 }
   0xd   : > { %p642_p8 = por %p54_p5, %p53_p3  ;;  %p137_p10 = scmp.eq.s32.totalorder %s379_s19, 1 }
   0xe   : > { %p646_p9 = por %p131_p6, %p47_p1  ;;  %p405_p13 = scmp.lt.s32.totalorder %s569_s17, 2 }
   0xf   : > { %s651_s26 = scalar_select %p38_p7, %s557_s14, %s40_s21  }
  0x10   : > { %s780_s25 = scalar_select %p646_p9, 1, 0 }
  0x11   : > { %p653_p11 = por %p137_p10, %p53_p3  ;;  %s171_s28 = sand.u32 1, %s557_s14  }
  0x12   : > { %s384_s29 = sshll.u32 %s171_s28, 1  ;;  %s385_s30 = sshll.u32 %s565_s16, 5 }
  0x13   : > { %s781_s27 = scalar_select %p653_p11, 1, 0 }
  0x14   : > { %s664_s6 = scalar_lea.hbm %s773_s0, %s385_s30  ;;  %s175_s7 = scalar_lea.vmem [#allocation2], %s384_s29 }
  0x15   : > { %s183_s8 = sshll.u32 %s175_s7, 4  ;;  %p670_p0 = pnand %p405_p13, %p636_p4  ;;  %s666_s8 = int_to_ptr.vmem [resolvable:$true] %s183_s8 }
  0x16   : > { %s172_s10 = scalar_lea.sflag [#allocation3], %s171_s28  ;;  %s457_s11 = scalar_lea.hbm %s664_s6, 32 }
  0x17   : > { %p458_p3 = scmp.ne.s32.totalorder %s664_s6, %s457_s11  ;;  %p459_p5 = pneg %p670_p0 }
  0x18   : > { %s462_s21 = scalar_lea.hbm %s773_s0, 64  ;;  %p463_p4 = scmp.lt.u32.totalorder %s664_s6, %s773_s0 }
  0x19   : > { %p460_p6 = pnand %p459_p5, %p458_p3  ;;  %p464_p10 = scmp.lt.u32.totalorder %s462_s21, %s457_s11 }
  0x1a   : > { %p466_p12 = scmp.lt.u32.totalorder %s457_s11, %s664_s6 }
  0x1b   : > { %p461_p7 = pneg %p460_p6  ;;  %p465_p13 = por %p464_p10, %p463_p4 }
  0x1d   : > { %p467_p1 = por %p466_p12, %p465_p13 }
  0x1f   : > { %p468_p2 = pnand %p467_p1, %p461_p7 }
  0x21   : > { %471 = shalt.err (!%p468_p2)
}
  0x22   : > { %s472_s28 = scalar_lea.vmem %s666_s8, 32  ;;  %s571_s29 = smov [#allocation2]  }
  0x23   : > { %p473_p3 = scmp.ne.s32.totalorder %s666_s8, %s472_s28  ;;  %s477_s30 = sshll.u32 %s571_s29, 4  ;;  %s478_s30 = int_to_ptr.vmem [resolvable:$false] %s477_s30 }
  0x24   : > { %s479_s4 = scalar_lea.vmem %s478_s30, 64  ;;  %p480_p9 = scmp.lt.s32.totalorder %s666_s8, %s478_s30 }
  0x25   : > { %p475_p6 = pnand %p473_p3, %p459_p5  ;;  %p481_p4 = scmp.lt.s32.totalorder %s479_s4, %s472_s28 }
  0x27   : > { %p476_p11 = pneg %p475_p6  ;;  %p482_p10 = por %p481_p4, %p480_p9 }
  0x29   : > { %p483_p12 = pnand %p482_p10, %p476_p11 }
  0x2b   : > { %486 = shalt.err (!%p483_p12)
}
  0x2c   : > { %400 = dma.hbm_to_vmem [thread:$0]  (!%p670_p0), %s664_s6, 32, %s666_s8, %s172_s10  }
  0x2d   : > { %p783_p1 = scmp.lt.s32.totalorder %s569_s17, 3  ;;  %p784_p2 = scmp.ge.s32.totalorder %s569_s17, 1 }
  0x2f   : > { %p189_p5 = pnand %p784_p2, %p783_p1 }
  0x30   : > { %s706_s5 = sand.u32 (!%p189_p5), 1, %s553_s13  }
  0x31   : > { %192 = sbr.rel (%p189_p5) target bundleno = 196 (0xc4), region = 32  ;;  %s387_s7 = sshll.u32 (!%p189_p5), %s706_s5, 1 }
  0x32   : > { %s195_s11 = scalar_lea.sflag (!%p189_p5), [#allocation3], %s706_s5  ;;  %s198_s18 = scalar_lea.vmem (!%p189_p5), [#allocation2], %s387_s7 }
  0x38   : > { %540 = dma.done.wait (%p642_p8), %s195_s11, 32  }
  0x39   : > { %542 = vsyncadd (%p642_p8), %s195_s11, 4294967264  ;;  %v237_v0 = vld [vmem:[%s198_s18] sm:$0x3]  ;;  %s572_s6 = smov 127   ;;  %s573_s8 = smov 1   ;;  %v240_v1 = vlaneseq }
  0x3a   : > { %244 = vrot.lane.b32.xlu0 %v237_v0, %s572_s6  ;;  %v238_v5 = vld [vmem:[%s774_s1] sm:$0x3]  ;;  %s390_s24 = sshll.u32 %s561_s15, 5  ;;  %s228_s22 = scalar_lea.vmem [#allocation5], %s387_s7 }
  0x3b   : > { %v241_v2 = vand.u32 127, %v240_v1  ;;  %v239_v6 = vld [vmem:[%s775_s2] sm:$0x3]  ;;  %v249_v7 = vmul.f32 %v238_v5, %v237_v0  ;;  %s268_s23 = sshll.u32 %s228_s22, 4  ;;  %s724_s30 = scalar_lea.hbm %s776_s3, %s390_s24  ;;  %s726_s23 = int_to_ptr.vmem [resolvable:$true] %s268_s23 }
  0x3c   : > { %s254_s4 = scalar_lea.sflag [#allocation4], %s706_s5  ;;  %s487_s11 = scalar_lea.vmem %s726_s23, 32 }
  0x3d   : > { %v242_v3 = vand.u32 1, %v241_v2  ;;  %p488_p8 = scmp.ne.s32.totalorder %s726_s23, %s487_s11  ;;  %p785_p9 = scmp.ne.s32.totalorder %s780_s25, 0 }
  0x3e   : > { %246 = vrot.lane.b32.xlu0 %v237_v0, %s573_s8  ;;  %s574_s15 = smov [#allocation5]  }
  0x3f   : > { %vm243_vm0 = vcmp.eq.s32.totalorder %v242_v3, 0  ;;  %p489_p11 = pnand %p488_p8, %p785_p9  ;;  %s491_s7 = sshll.u32 %s574_s15, 4  ;;  %s492_s7 = int_to_ptr.vmem [resolvable:$false] %s491_s7 }
  0x40   : > { %s493_s18 = scalar_lea.vmem %s492_s7, 64  ;;  %p494_p7 = scmp.lt.s32.totalorder %s726_s23, %s492_s7 }
  0x41   : > { %p490_p0 = pneg %p489_p11  ;;  %p495_p13 = scmp.lt.s32.totalorder %s493_s18, %s487_s11 }
  0x43   : > { %p496_p3 = por %p495_p13, %p494_p7 }
  0x45   : > { %p497_p6 = pnand %p496_p3, %p490_p0 }
  0xac   : > { %v245_v4 = vpop.permute.xlu0 %244 }
  0xb0   : > { %v247_v8 = vpop.permute.xlu0 %246 }
  0xb1   : > { %v248_v9 = vsel %vm243_vm0, %v245_v4, %v247_v8 }
  0xb2   : > { %v250_v10 = vmul.f32 %v248_v9, %v239_v6 }
  0xb4   : > { %v251_v11 = vadd.f32 %v250_v10, %v249_v7 }
  0xb6   : > { %252 = vst [vmem:[%s228_s22] sm:$0x3] %v251_v11 }
  0xb7   : > { %500 = shalt.err (!%p497_p6)
}
  0xb8   : > { %s501_s5 = scalar_lea.hbm %s724_s30, 32  ;;  %s505_s9 = scalar_lea.hbm %s776_s3, 64 }
  0xb9   : > { %p502_p4 = scmp.ne.s32.totalorder %s724_s30, %s501_s5  ;;  %p506_p1 = scmp.lt.u32.totalorder %s724_s30, %s776_s3 }
  0xba   : > { %p507_p2 = scmp.lt.u32.totalorder %s505_s9, %s501_s5  ;;  %p509_p8 = scmp.lt.u32.totalorder %s501_s5, %s724_s30 }
  0xbb   : > { %p503_p10 = pnand %p502_p4, %p785_p9 }
  0xbc   : > { %p508_p5 = por %p507_p2, %p506_p1 }
  0xbd   : > { %p504_p12 = pneg %p503_p10 }
  0xbe   : > { %p510_p11 = por %p509_p8, %p508_p5 }
  0xc0   : > { %p511_p0 = pnand %p510_p11, %p504_p12 }
  0xc2   : > { %514 = shalt.err (!%p511_p0)
}
  0xc3   : > { %395 = dma.vmem_to_hbm [thread:$0]  (%p785_p9), %s726_s23, 32, %s724_s30, %s254_s4  }
  0xc4 PF: > { %s280_s21 = sand.u32 1, %s549_s12   ;;  %p786_p7 = scmp.ne.s32.totalorder %s781_s27, 0 }
  0xc5   : > { %p787_p13 = scmp.ge.s32.totalorder %s569_s17, 2  ;;  %s281_s24 = scalar_lea.sflag [#allocation4], %s280_s21 }
  0xc7   : > { %p402_p3 = pnand %p787_p13, %p786_p7 }
  0xc9   : > { %544 = dma.done.wait (!%p402_p3), %s281_s24, 32  }
  0xca   : > { %546 = vsyncadd (!%p402_p3), %s281_s24, 4294967264  ;;  %s19_s17 = sadd.s32 1, %s569_s17   ;;  %s788_s12 = smov %s553_s13 }
  0xcb   : > { %p16_p6 = scmp.ge.s32.totalorder %s19_s17, 4   ;;  %s789_s13 = smov %s557_s14 }
  0xcc   : > { %s790_s14 = smov %s651_s26  ;;  %s791_s15 = smov %s565_s16 }
  0xcd   : > { %s792_s16 = smov %s794_s20  ;;  %18 = sbr.rel (!%p16_p6) target bundleno = 6 (0x6), region = 83 }
  0xd4   :  { %286 = vsyncpa [#allocation3], 1 }
  0xd5   :  { %288 = vsyncpa [#allocation3 + $0x1], 1 }
  0xd6   :  { %289 = vsyncpa [#allocation4], 1 }
  0xd7   :  { %291 = vsyncpa [#allocation4 + $0x1], 1 }

</bundles_post_ra>
